<compile_context>
chip_gen: v5e
topology: v5e:2x2
jax: 0.10.0
libtpu: 0.0.40
codegen_flags: <defaults>
</compile_context>

<pallas_src>
import functools

import jax
import jax.numpy as jnp
from jax import lax
from jax.experimental import pallas as pl
from jax.experimental.pallas import tpu as pltpu


def _round_up(x, m):
    return ((x + m - 1) // m) * m


def _act_fn(activation):
    if activation.lower() == "relu":
        return lambda y: jnp.maximum(y, 0.0)
    return jnp.tanh


# ------------- resident-weights kernel: whole (L, D, D) stack lives in VMEM -------------

def _resident_kernel(x_ref, wt_ref, o_ref, acc_ref, *, num_layers, act):
    """x_ref: (TB, D) tile; wt_ref: (L, D, D) full stack in VMEM; acc_ref: (TB, D) f32 carry."""
    acc_ref[...] = x_ref[...].astype(jnp.float32)
    cdt = wt_ref.dtype  # compute dtype for the MXU (bf16 by default, f32 accumulation)

    def body(l, carry):
        x = acc_ref[...]
        y = jnp.dot(x.astype(cdt), wt_ref[l], preferred_element_type=jnp.float32)
        acc_ref[...] = x * act(y)
        return carry

    unroll = True if num_layers <= 8 else 2
    lax.fori_loop(0, num_layers, body, 0, unroll=unroll)
    o_ref[...] = acc_ref[...].astype(o_ref.dtype)


# ------------- streamed-weights kernel: one (D, D) layer per grid step -------------

def _streamed_kernel(x_ref, wt_ref, o_ref, acc_ref, *, act):
    """grid = (batch_tiles, L); layer axis is 'arbitrary'; x carried in VMEM scratch."""
    l = pl.program_id(1)

    @pl.when(l == 0)
    def _():
        acc_ref[...] = x_ref[...].astype(jnp.float32)

    x = acc_ref[...]
    y = jnp.dot(x.astype(wt_ref.dtype), wt_ref[0], preferred_element_type=jnp.float32)
    x = x * act(y)
    acc_ref[...] = x

    @pl.when(l == pl.num_programs(1) - 1)
    def _():
        o_ref[...] = x.astype(o_ref.dtype)


# ---------------------------------- wrapper ----------------------------------

def prepare_hidden_gate_weights(weights, dtype=jnp.bfloat16):
    """One-time prep: torch nn.Linear weight is (out, in); transpose to (L, D_in, D_out)
    and cast to the MXU compute dtype (bf16 by default). Do this at load time, not per call."""
    return jnp.transpose(weights, (0, 2, 1)).astype(dtype)


def hidden_gate(x, wt, *, tb=256, activation="tanh", mode="auto",
                vmem_budget_bytes=40 * 2**20):
    """Pallas HiddenGate forward.

    x : (B, D)            activations (feature dim last -> 128-lane axis)
    wt: (L, D, D)         pre-transposed weights from prepare_hidden_gate_weights()
    """
    B, D = x.shape
    L, d_in, d_out = wt.shape
    assert d_in == D and d_out == D, "HiddenGate layers are square D x D"

    act = _act_fn(activation)

    # --- batch tiling: MXU-sized tiles, prefer >= 2 tiles when B allows (megacore) ---
    tb_eff = min(tb, _round_up(B, 128))
    if B > 128 and pl.cdiv(B, tb_eff) < 2:
        tb_eff = _round_up(pl.cdiv(B, 2), 128)
    nb = pl.cdiv(B, tb_eff)
    b_pad = nb * tb_eff
    x_in = jnp.pad(x, ((0, b_pad - B), (0, 0))) if b_pad != B else x

    # --- VMEM budget (bytes): pick resident vs streamed; derive vmem_limit ---
    w_item = jnp.dtype(wt.dtype).itemsize
    act_bytes = 5 * tb_eff * D * 4              # x/out double buffers + f32 carry scratch
    resident_need = L * D * D * w_item + act_bytes + (2 << 20)
    streamed_need = 2 * D * D * w_item + act_bytes + (2 << 20)

    if mode == "auto":
        mode = "resident" if resident_need <= vmem_budget_bytes else "streamed"

    if mode == "resident":
        need = resident_need
        kernel = functools.partial(_resident_kernel, num_layers=L, act=act)
        grid_spec = pltpu.PrefetchScalarGridSpec(
            num_scalar_prefetch=0,
            grid=(nb,),
            in_specs=[
                pl.BlockSpec((tb_eff, D), lambda i: (i, 0)),
                # full weight stack placed in VMEM once (not pipelined => single-buffered)
                pl.BlockSpec(memory_space=pltpu.MemorySpace.VMEM),
            ],
            out_specs=pl.BlockSpec((tb_eff, D), lambda i: (i, 0)),
            scratch_shapes=[pltpu.VMEM((tb_eff, D), jnp.float32)],
        )
        dim_sem = ("parallel",)
    elif mode == "streamed":
        need = streamed_need
        kernel = functools.partial(_streamed_kernel, act=act)
        grid_spec = pltpu.PrefetchScalarGridSpec(
            num_scalar_prefetch=0,
            grid=(nb, L),
            in_specs=[
                pl.BlockSpec((tb_eff, D), lambda i, l: (i, 0)),
                pl.BlockSpec((1, D, D), lambda i, l: (l, 0, 0)),
            ],
            out_specs=pl.BlockSpec((tb_eff, D), lambda i, l: (i, 0)),
            scratch_shapes=[pltpu.VMEM((tb_eff, D), jnp.float32)],
        )
        dim_sem = ("parallel", "arbitrary")
    else:
        raise ValueError(f"unknown mode: {mode!r}")

    vmem_limit = int(max(32 << 20, min(need + (8 << 20), 56 << 20)))

    out = pl.pallas_call(
        kernel,
        out_shape=jax.ShapeDtypeStruct((b_pad, D), x.dtype),
        grid_spec=grid_spec,
        compiler_params=pltpu.CompilerParams(
            dimension_semantics=dim_sem,
            vmem_limit_bytes=vmem_limit,
        ),
    )(x_in, wt)

    return out[:B] if b_pad != B else out


def hidden_gate_ref(x, weights):
    """Pure-JAX reference mirroring the PyTorch forward (weights in torch (out, in) layout)."""
    out = x
    for l in range(weights.shape[0]):
        out = out * jnp.tanh(out @ weights[l].T)
    return out


if __name__ == "__main__":
    key = jax.random.PRNGKey(0)
    B, D, L = 256, 128, 3          # batch, input_size, num_layers

    kx, kw = jax.random.split(key)
    x = jax.random.normal(kx, (B, D), dtype=jnp.float32)
    # Deterministic synthetic init (stand-in for weight_init); torch (out, in) layout.
    weights = 0.05 * jax.random.normal(kw, (L, D, D), dtype=jnp.float32)

    ref = hidden_gate_ref(x, weights)

    # f32 weights: exact-semantics check (resident + streamed paths)
    wt_f32 = prepare_hidden_gate_weights(weights, dtype=jnp.float32)
    out_res = jax.block_until_ready(hidden_gate(x, wt_f32, mode="resident"))
    assert out_res.shape == (B, D)
    assert jnp.allclose(out_res, ref, atol=1e-4, rtol=1e-4), "resident f32 mismatch"

    out_str = jax.block_until_ready(hidden_gate(x, wt_f32, mode="streamed"))
    assert jnp.allclose(out_str, ref, atol=1e-4, rtol=1e-4), "streamed f32 mismatch"

    # bf16 weights (default perf path on v6e/v7x): f32 carry/accumulation, looser tolerance
    wt_bf16 = prepare_hidden_gate_weights(weights)  # bf16 by default
    out_bf16 = jax.block_until_ready(hidden_gate(x, wt_bf16, mode="auto"))
    assert jnp.allclose(out_bf16, ref, atol=1e-1, rtol=5e-2), "bf16 mismatch"

    # non-multiple batch size exercises the padded-tail path
    out_tail = jax.block_until_ready(hidden_gate(x[:200], wt_f32))
    assert jnp.allclose(out_tail, ref[:200], atol=1e-4, rtol=1e-4), "tail mismatch"

    print("KERNEL_OK")
</pallas_src>

<mosaic_0001>
module attributes {stable_mosaic.version = 11 : i64} {
  func.func @_resident_kernel(%arg0: i32, %arg1: memref<128x128xf32, #tpu.memory_space<vmem>>, %arg2: memref<3x128x128xf32, #tpu.memory_space<vmem>>, %arg3: memref<128x128xf32, #tpu.memory_space<vmem>>, %arg4: memref<128x128xf32, #tpu.memory_space<vmem>>) attributes {dimension_semantics = [#tpu.dimension_semantics<parallel>], iteration_bounds = array<i64: 2>, scalar_prefetch = 0 : i64, scratch_operands = 1 : i64, tpu.core_type = #tpu.core_type<tc>, window_params = [{transform_indices = @transform_0, window_bounds = array<i64: 128, 128>}, {pipeline_mode = #tpu.pipeline_mode<synchronous>, transform_indices = @transform_1, window_bounds = array<i64: 3, 128, 128>}, {transform_indices = @transform_2, window_bounds = array<i64: 128, 128>}]} {
    %c0 = arith.constant 0 : index
    %c0_0 = arith.constant 0 : index
    %0 = vector.load %arg1[%c0, %c0_0] : memref<128x128xf32, #tpu.memory_space<vmem>>, vector<128x128xf32>
    %c0_1 = arith.constant 0 : index
    %c0_2 = arith.constant 0 : index
    %1 = vector.load %arg4[%c0_1, %c0_2] : memref<128x128xf32, #tpu.memory_space<vmem>>, vector<128x128xf32>
    tpu.vector_store %arg4[%c0_1, %c0_2], %0 {strides = array<i32>} : memref<128x128xf32, #tpu.memory_space<vmem>>, vector<128x128xf32>,
    %c0_i32 = arith.constant 0 : i32
    %c0_3 = arith.constant 0 : index
    %c0_4 = arith.constant 0 : index
    %2 = vector.load %arg4[%c0_3, %c0_4] : memref<128x128xf32, #tpu.memory_space<vmem>>, vector<128x128xf32>
    %3 = arith.index_cast %c0_i32 : i32 to index
    %c0_5 = arith.constant 0 : index
    %c0_6 = arith.constant 0 : index
    %4 = vector.load %arg2[%3, %c0_5, %c0_6] : memref<3x128x128xf32, #tpu.memory_space<vmem>>, vector<1x128x128xf32>
    %5 = vector.shape_cast %4 : vector<1x128x128xf32> to vector<128x128xf32>
    %cst = arith.constant dense<0.000000e+00> : vector<128x128xf32>
    %6 = tpu.matmul %2, %5, %cst {dimension_numbers = #tpu.dot_dimension_numbers<[1], [0], [0], [1], [0, 0, 1, 1], [], []>} : vector<128x128xf32>, vector<128x128xf32>, vector<128x128xf32> -> vector<128x128xf32>
    %7 = math.tanh %6 : vector<128x128xf32>
    %8 = arith.mulf %2, %7 : vector<128x128xf32>
    %c0_7 = arith.constant 0 : index
    %c0_8 = arith.constant 0 : index
    %9 = vector.load %arg4[%c0_7, %c0_8] : memref<128x128xf32, #tpu.memory_space<vmem>>, vector<128x128xf32>
    tpu.vector_store %arg4[%c0_7, %c0_8], %8 {strides = array<i32>} : memref<128x128xf32, #tpu.memory_space<vmem>>, vector<128x128xf32>,
    %c1_i32 = arith.constant 1 : i32
    %c0_9 = arith.constant 0 : index
    %c0_10 = arith.constant 0 : index
    %10 = vector.load %arg4[%c0_9, %c0_10] : memref<128x128xf32, #tpu.memory_space<vmem>>, vector<128x128xf32>
    %11 = arith.index_cast %c1_i32 : i32 to index
    %c0_11 = arith.constant 0 : index
    %c0_12 = arith.constant 0 : index
    %12 = vector.load %arg2[%11, %c0_11, %c0_12] : memref<3x128x128xf32, #tpu.memory_space<vmem>>, vector<1x128x128xf32>
    %13 = vector.shape_cast %12 : vector<1x128x128xf32> to vector<128x128xf32>
    %cst_13 = arith.constant dense<0.000000e+00> : vector<128x128xf32>
    %14 = tpu.matmul %10, %13, %cst_13 {dimension_numbers = #tpu.dot_dimension_numbers<[1], [0], [0], [1], [0, 0, 1, 1], [], []>} : vector<128x128xf32>, vector<128x128xf32>, vector<128x128xf32> -> vector<128x128xf32>
    %15 = math.tanh %14 : vector<128x128xf32>
    %16 = arith.mulf %10, %15 : vector<128x128xf32>
    %c0_14 = arith.constant 0 : index
    %c0_15 = arith.constant 0 : index
    %17 = vector.load %arg4[%c0_14, %c0_15] : memref<128x128xf32, #tpu.memory_space<vmem>>, vector<128x128xf32>
    tpu.vector_store %arg4[%c0_14, %c0_15], %16 {strides = array<i32>} : memref<128x128xf32, #tpu.memory_space<vmem>>, vector<128x128xf32>,
    %c2_i32 = arith.constant 2 : i32
    %c0_16 = arith.constant 0 : index
    %c0_17 = arith.constant 0 : index
    %18 = vector.load %arg4[%c0_16, %c0_17] : memref<128x128xf32, #tpu.memory_space<vmem>>, vector<128x128xf32>
    %19 = arith.index_cast %c2_i32 : i32 to index
    %c0_18 = arith.constant 0 : index
    %c0_19 = arith.constant 0 : index
    %20 = vector.load %arg2[%19, %c0_18, %c0_19] : memref<3x128x128xf32, #tpu.memory_space<vmem>>, vector<1x128x128xf32>
    %21 = vector.shape_cast %20 : vector<1x128x128xf32> to vector<128x128xf32>
    %cst_20 = arith.constant dense<0.000000e+00> : vector<128x128xf32>
    %22 = tpu.matmul %18, %21, %cst_20 {dimension_numbers = #tpu.dot_dimension_numbers<[1], [0], [0], [1], [0, 0, 1, 1], [], []>} : vector<128x128xf32>, vector<128x128xf32>, vector<128x128xf32> -> vector<128x128xf32>
    %23 = math.tanh %22 : vector<128x128xf32>
    %24 = arith.mulf %18, %23 : vector<128x128xf32>
    %c0_21 = arith.constant 0 : index
    %c0_22 = arith.constant 0 : index
    %25 = vector.load %arg4[%c0_21, %c0_22] : memref<128x128xf32, #tpu.memory_space<vmem>>, vector<128x128xf32>
    tpu.vector_store %arg4[%c0_21, %c0_22], %24 {strides = array<i32>} : memref<128x128xf32, #tpu.memory_space<vmem>>, vector<128x128xf32>,
    %c3_i32 = arith.constant 3 : i32
    %c0_23 = arith.constant 0 : index
    %c0_24 = arith.constant 0 : index
    %26 = vector.load %arg4[%c0_23, %c0_24] : memref<128x128xf32, #tpu.memory_space<vmem>>, vector<128x128xf32>
    %c0_25 = arith.constant 0 : index
    %c0_26 = arith.constant 0 : index
    %27 = vector.load %arg3[%c0_25, %c0_26] : memref<128x128xf32, #tpu.memory_space<vmem>>, vector<128x128xf32>
    tpu.vector_store %arg3[%c0_25, %c0_26], %26 {strides = array<i32>} : memref<128x128xf32, #tpu.memory_space<vmem>>, vector<128x128xf32>,
    return
  }
  func.func @transform_0(%arg0: i32) -> (i32, i32) {
    %c0_i32 = arith.constant 0 : i32
    %c0_i32_0 = arith.constant 0 : i32
    return %arg0, %c0_i32 : i32, i32
  }
  func.func @transform_1(%arg0: i32) -> (i32, i32, i32) {
    %c0_i32 = arith.constant 0 : i32
    %c0_i32_0 = arith.constant 0 : i32
    %c0_i32_1 = arith.constant 0 : i32
    %c0_i32_2 = arith.constant 0 : i32
    return %c0_i32, %c0_i32_0, %c0_i32_1 : i32, i32, i32
  }
  func.func @transform_2(%arg0: i32) -> (i32, i32) {
    %c0_i32 = arith.constant 0 : i32
    %c0_i32_0 = arith.constant 0 : i32
    return %arg0, %c0_i32 : i32, i32
  }
}

</mosaic_0001>

<bundles_post_ra>
// kernel: tpu_custom_call.1
= control target key start
LH: loop header
LB: loop body
LE: loop exit
PB: predicated region body
PF: predicated region fallthrough
CT: control target
= control target key end

     0   :  { %7 = vsyncpa [#allocation4], 0  ;;  %s1535_s0 = inlined_call_operand.hbm [shape: f32[256,128], index: 0, kind: input, shape index: {}]   ;;  %s1536_s1 = inlined_call_operand.hbm [shape: f32[3,128,128], index: 1, kind: input, shape index: {}]   ;;  %s1537_s2 = inlined_call_operand.hbm [shape: f32[256,128], index: 2, kind: output, shape index: {}]  }
   0x1   :  { %9 = vsyncpa [#allocation4 + $0x1], 0 }
   0x2   :  { %10 = vsyncpa [#allocation7], 0 }
   0x3   :  { %11 = vsyncpa [#allocation5], 0 }
   0x4   :  { %13 = vsyncpa [#allocation5 + $0x1], 0  ;;  %s1158_s9 = smov 0   ;;  %s1160_s10 = smov 0  }
   0x5   :  { %s1162_s11 = smov 0   ;;  %s1164_s12 = smov 0  }
   0x6 LB: > { %s1179_s13 = sadd.s32 4294967295, %s1136_s12   ;;  %s783_s14 = sadd.s32 4294967294, %s1136_s12   ;;  %s1136_s12 = sphi %s1164_s12, %s1547_s12   ;;  %s1132_s11 = sphi %s1162_s11, %s1546_s11   ;;  %s1128_s10 = sphi %s1160_s10, %s1545_s10   ;;  %s1124_s9 = sphi %s1158_s9, %s1544_s9  }
   0x7   : > { %p39_p0 = scmp.ne.s32.totalorder %s1128_s10, %s1124_s9  ;;  %p40_p1 = scmp.eq.s32.totalorder %s1179_s13, 0 }
   0x8   : > { %p84_p2 = scmp.eq.s32.totalorder %s1179_s13, 1  ;;  %p90_p3 = scmp.eq.s32.totalorder %s783_s14, 1 }
   0x9   : > { %p1188_p4 = por %p40_p1, %p39_p0  ;;  %p784_p5 = scmp.ge.s32.totalorder %s1136_s12, 1 }
   0xa   : > { %p1193_p6 = por %p90_p3, %p39_p0  ;;  %p97_p7 = scmp.lt.s32.totalorder %s1136_s12, 3 }
   0xb   : > { %s108_s19 = sshll.u32 %s1536_s1, 4  ;;  %s1138_s21 = smov [#allocation6]   ;;  %s109_s19 = int_to_ptr.hbm [resolvable:$true] %s108_s19 }
   0xc   : > { %p1201_p8 = pnand %p784_p5, %p97_p7  ;;  %s110_s22 = sshll.u32 %s1138_s21, 4  ;;  %s111_s22 = int_to_ptr.vmem [resolvable:$true] %s110_s22 }
   0xd   : > { %s1211_s23 = sadd.s32 1, %s1136_s12   ;;  %s1139_s24 = smov 128  }
   0xe   : > { %p857_p9 = pneg %p1201_p8  ;;  %s1140_s25 = smov 8  }
   0xf   : > { %s23_s26 = ssub.s32 %s1136_s12, %s1211_s23  ;;  %s26_s27 = sadd.s32 1, %s1132_s11 }
  0x10   : > { %p858_p10 = pnand %p857_p9, %p40_p1  ;;  %p24_p12 = scmp.eq.s32.totalorder %s23_s26, 0 }
  0x11   : > { %p33_p13 = scmp.ne.s32.totalorder %s1132_s11, %s1128_s10  ;;  %p34_p0 = scmp.eq.s32.totalorder %s1136_s12, 0 }
  0x12   : > { %860 = dma.hbm_to_vmem [thread:$0]  (!%p858_p10), %s109_s19, 6144, %s111_s22, [#allocation7], %s1139_s24, %s1139_s24, %s1140_s25  }
  0x13   : > { %s1223_s28 = scalar_select %p24_p12, %s1132_s11, %s26_s27  }
  0x14   : > { %p1227_p3 = por %p84_p2, %p33_p13  ;;  %p870_p5 = scmp.lt.s32.totalorder %s1136_s12, 2 }
  0x15   : > { %s124_s30 = sand.u32 1, %s1132_s11   ;;  %s799_s3 = sshll.u32 %s1136_s12, 7 }
  0x16   : > { %p35_p7 = por %p34_p0, %p33_p13  ;;  %s787_s4 = sshll.u32 %s124_s30, 7 }
  0x17   : > { %s133_s7 = scalar_lea.hbm %s1535_s0, %s799_s3  ;;  %s128_s14 = scalar_lea.vmem [#allocation3], %s787_s4 }
  0x18   : > { %s134_s8 = sshll.u32 %s133_s7, 4  ;;  %s136_s17 = sshll.u32 %s128_s14, 4  ;;  %s135_s8 = int_to_ptr.hbm [resolvable:$true] %s134_s8  ;;  %s137_s17 = int_to_ptr.vmem [resolvable:$true] %s136_s17 }
  0x19   : > { %p1237_p9 = pnand %p870_p5, %p35_p7  ;;  %s125_s19 = scalar_lea.sflag [#allocation4], %s124_s30 }
  0x1a   : > { %s1036_s21 = sshra.s32 %s135_s8, 4  ;;  %s1043_s3 = scalar_lea.hbm %s1535_s0, 256  ;;  %s1037_s21 = int_to_ptr.hbm [resolvable:$true] %s1036_s21 }
  0x1b   : > { %s1038_s22 = scalar_lea.hbm %s1037_s21, 128  ;;  %p1040_p10 = pneg %p1237_p9 }
  0x1c   : > { %p1039_p2 = scmp.ne.s32.totalorder %s1037_s21, %s1038_s22  ;;  %p1044_p0 = scmp.lt.s32.totalorder %s1037_s21, %s1535_s0 }
  0x1d   : > { %p1045_p5 = scmp.lt.s32.totalorder %s1043_s3, %s1038_s22 }
  0x1e   : > { %p1041_p12 = pnand %p1040_p10, %p1039_p2 }
  0x1f   : > { %p1046_p7 = por %p1045_p5, %p1044_p0 }
  0x20   : > { %p1042_p13 = pneg %p1041_p12 }
  0x22   : > { %p1047_p11 = pnand %p1046_p7, %p1042_p13 }
  0x24   : > { %1050 = shalt.err (!%p1047_p11)
}
  0x25   : > { %864 = dma.hbm_to_vmem [thread:$0]  (!%p1237_p9), %s135_s8, 2048, %s137_s17, %s125_s19, %s1139_s24, %s1139_s24, %s1140_s25  }
  0x26   : > { %148 = sbr.rel (%p1201_p8) target bundleno = 581 (0x245), region = 28  ;;  %s1257_s30 = sand.u32 (!%p1201_p8), 1, %s1128_s10  }
  0x27   : > { %s791_s6 = sshll.u32 (!%p1201_p8), %s1257_s30, 7  ;;  %s151_s7 = scalar_lea.sflag (!%p1201_p8), [#allocation4], %s1257_s30 }
  0x28   : > { %s1263_s14 = scalar_lea.vmem (!%p1201_p8), [#allocation3], %s791_s6 }
  0x2b   : > { %1111 = dma.done.wait (%p1188_p4), %s151_s7, 2048  }
  0x2c   : > { %1113 = vsyncadd (%p1188_p4), %s151_s7, 4294965248 }
  0x2d   : > { %1115 = dma.done.wait (%p40_p1), [#allocation7], 6144  }
  0x2e   : > { %1117 = vsyncadd (%p40_p1), [#allocation7], 4294961152  ;;  %v246_v0 = vld [vmem:[#allocation6 + $0x78] sm:$0xff]  ;;  %v245_v1 = vld [vmem:[#allocation6 + $0x70] sm:$0xff]  ;;  %s1468_s15 = scalar_lea.vmem [#allocation8], %s791_s6  ;;  %s800_s20 = sshll.u32 %s1179_s13, 7 }
  0x2f   : > { %247 = vmatpush.msra.mxu0 %v246_v0  ;;  %801 = vmatpush.msra.mxu3 %v246_v0  ;;  %v244_v2 = vld [vmem:[#allocation6 + $0x68] sm:$0xff]  ;;  %v243_v3 = vld [vmem:[#allocation6 + $0x60] sm:$0xff]  ;;  %v242_v4 = vld [vmem:[#allocation6 + $0x58] sm:$0xff]  ;;  %s696_s8 = scalar_lea.hbm %s1537_s2, %s800_s20  ;;  %s697_s17 = sshll.u32 %s1468_s15, 4  ;;  %s698_s17 = int_to_ptr.vmem [resolvable:$true] %s697_s17 }
  0x30   : > { %v241_v5 = vld [vmem:[#allocation6 + $0x50] sm:$0xff]  ;;  %v240_v6 = vld [vmem:[#allocation6 + $0x48] sm:$0xff]  ;;  %v239_v7 = vld [vmem:[#allocation6 + $0x40] sm:$0xff]  ;;  %s699_s18 = sshll.u32 %s696_s8, 4  ;;  %s685_s13 = scalar_lea.sflag [#allocation5], %s1257_s30  ;;  %s700_s18 = int_to_ptr.hbm [resolvable:$true] %s699_s18 }
  0x31   : > { %248 = vmatpush.msra.mxu0 %v245_v1  ;;  %802 = vmatpush.msra.mxu3 %v245_v1  ;;  %v238_v8 = vld [vmem:[#allocation6 + $0x38] sm:$0xff]  ;;  %v237_v9 = vld [vmem:[#allocation6 + $0x30] sm:$0xff]  ;;  %v236_v10 = vld [vmem:[#allocation6 + $0x28] sm:$0xff]  ;;  %s1080_s19 = sshra.s32 %s700_s18, 4  ;;  %s1086_s27 = scalar_lea.hbm %s1537_s2, 256  ;;  %s1081_s19 = int_to_ptr.hbm [resolvable:$true] %s1080_s19 }
  0x32   : > { %v235_v11 = vld [vmem:[#allocation6 + $0x20] sm:$0xff]  ;;  %v234_v12 = vld [vmem:[#allocation6 + $0x18] sm:$0xff]  ;;  %v233_v13 = vld [vmem:[#allocation6 + $0x10] sm:$0xff]  ;;  %s1082_s21 = scalar_lea.hbm %s1081_s19, 128  ;;  %p1087_p11 = scmp.lt.s32.totalorder %s1081_s19, %s1537_s2 }
  0x33   : > { %249 = vmatpush.msra.mxu0 %v244_v2  ;;  %803 = vmatpush.msra.mxu3 %v244_v2  ;;  %v232_v14 = vld [vmem:[#allocation6 + $0x8] sm:$0xff]  ;;  %v231_v15 = vld [vmem:[#allocation6] sm:$0xff]  ;;  %v1290_v20 = vld [vmem:[%s1263_s14 + $0x10] sm:$0xff]  ;;  %p1083_p1 = scmp.ne.s32.totalorder %s1081_s19, %s1082_s21  ;;  %p1088_p9 = scmp.lt.s32.totalorder %s1086_s27, %s1082_s21 }
  0x34   : > { %v1274_v16 = vld [vmem:[%s1263_s14] sm:$0xff]  ;;  %v1282_v18 = vld [vmem:[%s1263_s14 + $0x8] sm:$0xff]  ;;  %v1293_v21 = vld [vmem:[%s1263_s14 + $0x70] sm:$0xff] }
  0x35   : > { %250 = vmatpush.msra.mxu0 %v243_v3  ;;  %804 = vmatpush.msra.mxu3 %v243_v3  ;;  %v1277_v17 = vld [vmem:[%s1263_s14 + $0x60] sm:$0xff]  ;;  %v1285_v19 = vld [vmem:[%s1263_s14 + $0x68] sm:$0xff]  ;;  %v1298_v22 = vld [vmem:[%s1263_s14 + $0x18] sm:$0xff]  ;;  %p1084_p4 = pnand %p1083_p1, %p1227_p3  ;;  %p1089_p2 = por %p1088_p9, %p1087_p11 }
  0x36   : > { %v1301_v23 = vld [vmem:[%s1263_s14 + $0x78] sm:$0xff]  ;;  %v1306_v24 = vld [vmem:[%s1263_s14 + $0x20] sm:$0xff]  ;;  %v1310_v25 = vld [vmem:[%s1263_s14 + $0x28] sm:$0xff] }
  0x37   : > { %251 = vmatpush.msra.mxu0 %v242_v4  ;;  %805 = vmatpush.msra.mxu3 %v242_v4  ;;  %v1314_v26 = vld [vmem:[%s1263_s14 + $0x30] sm:$0xff]  ;;  %v1318_v27 = vld [vmem:[%s1263_s14 + $0x38] sm:$0xff]  ;;  %v390_v30 = vld [vmem:[#allocation6 + $0xe8] sm:$0xff]  ;;  %p1085_p8 = pneg %p1084_p4 }
  0x38   : > { %v392_v28 = vld [vmem:[#allocation6 + $0xf8] sm:$0xff]  ;;  %v391_v29 = vld [vmem:[#allocation6 + $0xf0] sm:$0xff]  ;;  %v389_v31 = vld [vmem:[#allocation6 + $0xe0] sm:$0xff] }
  0x39   : > { %252 = vmatpush.msra.mxu0 %v241_v5  ;;  %806 = vmatpush.msra.mxu3 %v241_v5  ;;  %v1322_v32 = vld [vmem:[%s1263_s14 + $0x40] sm:$0xff]  ;;  %v388_v33 = vld [vmem:[#allocation6 + $0xd8] sm:$0xff]  ;;  %v387_v34 = vld [vmem:[#allocation6 + $0xd0] sm:$0xff]  ;;  %p1090_p10 = pnand %p1089_p2, %p1085_p8 }
  0x3a   : > { %393 = vmatpush.msra.mxu1 %v392_v28  ;;  %v386_v35 = vld [vmem:[#allocation6 + $0xc8] sm:$0xff]  ;;  %v385_v36 = vld [vmem:[#allocation6 + $0xc0] sm:$0xff]  ;;  %v384_v38 = vld [vmem:[#allocation6 + $0xb8] sm:$0xff] }
  0x3b   : > { %253 = vmatpush.msra.mxu0 %v240_v6  ;;  %807 = vmatpush.msra.mxu3 %v240_v6  ;;  %v1326_v37 = vld [vmem:[%s1263_s14 + $0x48] sm:$0xff]  ;;  %v383_v39 = vld [vmem:[#allocation6 + $0xb0] sm:$0xff]  ;;  %v1334_v42 = vld [vmem:[%s1263_s14 + $0x58] sm:$0xff] }
  0x3c   : > { %394 = vmatpush.msra.mxu1 %v391_v29  ;;  %v382_v40 = vld [vmem:[#allocation6 + $0xa8] sm:$0xff]  ;;  %v1330_v41 = vld [vmem:[%s1263_s14 + $0x50] sm:$0xff]  ;;  %v381_v43 = vld [vmem:[#allocation6 + $0xa0] sm:$0xff] }
  0x3d   : > { %254 = vmatpush.msra.mxu0 %v239_v7  ;;  %808 = vmatpush.msra.mxu3 %v239_v7  ;;  %v380_v44 = vld [vmem:[#allocation6 + $0x98] sm:$0xff]  ;;  %v379_v45 = vld [vmem:[#allocation6 + $0x90] sm:$0xff]  ;;  %v378_v46 = vld [vmem:[#allocation6 + $0x88] sm:$0xff] }
  0x3e   : > { %395 = vmatpush.msra.mxu1 %v390_v30  ;;  %v377_v47 = vld [vmem:[#allocation6 + $0x80] sm:$0xff] }
  0x3f   : > { %255 = vmatpush.msra.mxu0 %v238_v8  ;;  %809 = vmatpush.msra.mxu3 %v238_v8 }
  0x40   : > { %396 = vmatpush.msra.mxu1 %v389_v31 }
  0x41   : > { %256 = vmatpush.msra.mxu0 %v237_v9  ;;  %810 = vmatpush.msra.mxu3 %v237_v9 }
  0x42   : > { %397 = vmatpush.msra.mxu1 %v388_v33 }
  0x43   : > { %257 = vmatpush.msra.mxu0 %v236_v10  ;;  %811 = vmatpush.msra.mxu3 %v236_v10 }
  0x44   : > { %398 = vmatpush.msra.mxu1 %v387_v34 }
  0x45   : > { %258 = vmatpush.msra.mxu0 %v235_v11  ;;  %812 = vmatpush.msra.mxu3 %v235_v11 }
  0x46   : > { %399 = vmatpush.msra.mxu1 %v386_v35 }
  0x47   : > { %259 = vmatpush.msra.mxu0 %v234_v12  ;;  %813 = vmatpush.msra.mxu3 %v234_v12 }
  0x48   : > { %400 = vmatpush.msra.mxu1 %v385_v36 }
  0x49   : > { %260 = vmatpush.msra.mxu0 %v233_v13  ;;  %814 = vmatpush.msra.mxu3 %v233_v13 }
  0x4a   : > { %401 = vmatpush.msra.mxu1 %v384_v38 }
  0x4b   : > { %261 = vmatpush.msra.mxu0 %v232_v14  ;;  %815 = vmatpush.msra.mxu3 %v232_v14 }
  0x4c   : > { %402 = vmatpush.msra.mxu1 %v383_v39 }
  0x4d   : > { %262 = vmatpush.msra.mxu0 %v231_v15  ;;  %816 = vmatpush.msra.mxu3 %v231_v15 }
  0x4e   : > { %263 = vmatmul.f32.vlgmr.msra.gmra.mxu0 %v1274_v16  ;;  %299 = vmatmul.f32.vlgmr.msra.gmra.mxu3 %v1277_v17 }
  0x4f   : > { %817 = vmatpush.msrb.mxu3 %v392_v28  ;;  %403 = vmatpush.msra.mxu1 %v382_v40 }
  0x51   : > { %818 = vmatpush.msrb.mxu3 %v391_v29  ;;  %404 = vmatpush.msra.mxu1 %v381_v43  ;;  %v533_v29 = vld [vmem:[#allocation6 + $0x150] sm:$0xff] }
  0x53   : > { %819 = vmatpush.msrb.mxu3 %v390_v30  ;;  %405 = vmatpush.msra.mxu1 %v380_v44  ;;  %v532_v30 = vld [vmem:[#allocation6 + $0x148] sm:$0xff] }
  0x55   : > { %820 = vmatpush.msrb.mxu3 %v389_v31  ;;  %406 = vmatpush.msra.mxu1 %v379_v45  ;;  %v531_v31 = vld [vmem:[#allocation6 + $0x140] sm:$0xff] }
  0x56   : > { %266 = vmatmul.f32.gmra.mxu0 %v1282_v18  ;;  %302 = vmatmul.f32.gmra.mxu3 %v1285_v19 }
  0x57   : > { %821 = vmatpush.msrb.mxu3 %v388_v33  ;;  %407 = vmatpush.msra.mxu1 %v378_v46 }
  0x59   : > { %822 = vmatpush.msrb.mxu3 %v387_v34  ;;  %408 = vmatpush.msra.mxu1 %v377_v47 }
  0x5b   : > { %823 = vmatpush.msrb.mxu3 %v386_v35  ;;  %v530_v35 = vld [vmem:[#allocation6 + $0x138] sm:$0xff] }
  0x5d   : > { %824 = vmatpush.msrb.mxu3 %v385_v36  ;;  %v529_v36 = vld [vmem:[#allocation6 + $0x130] sm:$0xff] }
  0x5e   : > { %269 = vmatmul.f32.gmra.mxu0 %v1290_v20  ;;  %305 = vmatmul.f32.gmra.mxu3 %v1293_v21 }
  0x5f   : > { %825 = vmatpush.msrb.mxu3 %v384_v38  ;;  %v528_v38 = vld [vmem:[#allocation6 + $0x128] sm:$0xff] }
  0x61   : > { %826 = vmatpush.msrb.mxu3 %v383_v39 }
  0x63   : > { %827 = vmatpush.msrb.mxu3 %v382_v40 }
  0x65   : > { %828 = vmatpush.msrb.mxu3 %v381_v43 }
  0x66   : > { %272 = vmatmul.f32.gmra.mxu0 %v1298_v22  ;;  %308 = vmatmul.f32.gmra.mxu3 %v1301_v23 }
  0x67   : > { %829 = vmatpush.msrb.mxu3 %v380_v44 }
  0x69   : > { %830 = vmatpush.msrb.mxu3 %v379_v45  ;;  %v527_v45 = vld [vmem:[#allocation6 + $0x120] sm:$0xff] }
  0x6b   : > { %831 = vmatpush.msrb.mxu3 %v378_v46  ;;  %v526_v46 = vld [vmem:[#allocation6 + $0x118] sm:$0xff] }
  0x6d   : > { %832 = vmatpush.msrb.mxu3 %v377_v47  ;;  %v525_v47 = vld [vmem:[#allocation6 + $0x110] sm:$0xff] }
  0x6e   : > { %275 = vmatmul.f32.gmra.mxu0 %v1306_v24 }
  0x76   : > { %278 = vmatmul.f32.gmra.mxu0 %v1310_v25 }
  0x7e   : > { %281 = vmatmul.f32.gmra.mxu0 %v1314_v26 }
  0x86   : > { %284 = vmatmul.f32.gmra.mxu0 %v1318_v27 }
  0x8e   : > { %287 = vmatmul.f32.gmra.mxu0 %v1322_v32 }
  0x96   : > { %290 = vmatmul.f32.gmra.mxu0 %v1326_v37 }
  0x9e   : > { %293 = vmatmul.f32.gmra.mxu0 %v1330_v41 }
  0xa6   : > { %296 = vmatmul.f32.gmra.mxu0 %v1334_v42 }
  0xcb   : > { %v264_v48 = vpop.f32.mrf.mxu0 }
  0xcc   : > { %910 = vtanh.f32 %v264_v48  ;;  %v524_v48 = vld [vmem:[#allocation6 + $0x108] sm:$0xff] }
  0xd1   : > { %v300_v49 = vpop.f32.mrf.mxu3 }
  0xd2   : > { %v911_v50 = vpop.eup %910  ;;  %912 = vtanh.f32 %v300_v49 }
  0xd3   : > { %v267_v51 = vpop.f32.mrf.mxu0  ;;  %v1338_v52 = vmul.f32 %v911_v50, %v1274_v16 }
  0xd4   : > { %914 = vtanh.f32 %v267_v51 }
  0xd5   : > { %409 = vmatmul.f32.vlgmr.msra.gmra.mxu1 %v1338_v52 }
  0xd8   : > { %v913_v53 = vpop.eup %912 }
  0xd9   : > { %v303_v54 = vpop.f32.mrf.mxu3  ;;  %v1342_v55 = vmul.f32 %v913_v53, %v1277_v17 }
  0xda   : > { %v915_v56 = vpop.eup %914  ;;  %916 = vtanh.f32 %v303_v54 }
  0xdb   : > { %v270_v57 = vpop.f32.mrf.mxu0  ;;  %445 = vmatmul.f32.vlgmr.msrb.gmra.mxu3 %v1342_v55  ;;  %v1346_v58 = vmul.f32 %v915_v56, %v1282_v18 }
  0xdc   : > { %918 = vtanh.f32 %v270_v57 }
  0xdd   : > { %412 = vmatmul.f32.gmra.mxu1 %v1346_v58 }
  0xe0   : > { %v917_v59 = vpop.eup %916 }
  0xe1   : > { %v306_v60 = vpop.f32.mrf.mxu3  ;;  %v1350_v61 = vmul.f32 %v917_v59, %v1285_v19 }
  0xe2   : > { %v919_v62 = vpop.eup %918  ;;  %920 = vtanh.f32 %v306_v60 }
  0xe3   : > { %v273_v63 = vpop.f32.mrf.mxu0  ;;  %448 = vmatmul.f32.gmra.mxu3 %v1350_v61  ;;  %v1354_v0 = vmul.f32 %v919_v62, %v1290_v20 }
  0xe4   : > { %922 = vtanh.f32 %v273_v63 }
  0xe5   : > { %415 = vmatmul.f32.gmra.mxu1 %v1354_v0 }
  0xe8   : > { %v921_v1 = vpop.eup %920 }
  0xe9   : > { %v309_v2 = vpop.f32.mrf.mxu3  ;;  %v1358_v3 = vmul.f32 %v921_v1, %v1293_v21  ;;  %v538_v21 = vld [vmem:[#allocation6 + $0x178] sm:$0xff] }
  0xea   : > { %v923_v4 = vpop.eup %922  ;;  %924 = vtanh.f32 %v309_v2  ;;  %539 = vmatpush.msra.mxu2 %v538_v21  ;;  %833 = vmatpush.msra.mxu3 %v538_v21 }
  0xeb   : > { %v276_v5 = vpop.f32.mrf.mxu0  ;;  %451 = vmatmul.f32.gmra.mxu3 %v1358_v3  ;;  %v1362_v6 = vmul.f32 %v923_v4, %v1298_v22  ;;  %v537_v22 = vld [vmem:[#allocation6 + $0x170] sm:$0xff] }
  0xec   : > { %926 = vtanh.f32 %v276_v5  ;;  %540 = vmatpush.msra.mxu2 %v537_v22  ;;  %834 = vmatpush.msra.mxu3 %v537_v22 }
  0xed   : > { %418 = vmatmul.f32.gmra.mxu1 %v1362_v6 }
  0xf0   : > { %v925_v7 = vpop.eup %924 }
  0xf1   : > { %v1366_v8 = vmul.f32 %v925_v7, %v1301_v23  ;;  %v536_v23 = vld [vmem:[#allocation6 + $0x168] sm:$0xff] }
  0xf2   : > { %v927_v9 = vpop.eup %926  ;;  %541 = vmatpush.msra.mxu2 %v536_v23  ;;  %835 = vmatpush.msra.mxu3 %v536_v23 }
  0xf3   : > { %v279_v10 = vpop.f32.mrf.mxu0  ;;  %454 = vmatmul.f32.gmra.mxu3 %v1366_v8  ;;  %v1370_v11 = vmul.f32 %v927_v9, %v1306_v24  ;;  %v535_v24 = vld [vmem:[#allocation6 + $0x160] sm:$0xff] }
  0xf4   : > { %928 = vtanh.f32 %v279_v10  ;;  %542 = vmatpush.msra.mxu2 %v535_v24  ;;  %836 = vmatpush.msra.mxu3 %v535_v24 }
  0xf5   : > { %421 = vmatmul.f32.gmra.mxu1 %v1370_v11 }
  0xfa   : > { %v929_v12 = vpop.eup %928 }
  0xfb   : > { %v282_v13 = vpop.f32.mrf.mxu0  ;;  %v1374_v14 = vmul.f32 %v929_v12, %v1310_v25 }
  0xfc   : > { %930 = vtanh.f32 %v282_v13 }
  0xfd   : > { %424 = vmatmul.f32.gmra.mxu1 %v1374_v14 }
 0x102   : > { %v931_v15 = vpop.eup %930 }
 0x103   : > { %v285_v16 = vpop.f32.mrf.mxu0  ;;  %v1378_v17 = vmul.f32 %v931_v15, %v1314_v26 }
 0x104   : > { %932 = vtanh.f32 %v285_v16 }
 0x105   : > { %427 = vmatmul.f32.gmra.mxu1 %v1378_v17 }
 0x10a   : > { %v933_v18 = vpop.eup %932 }
 0x10b   : > { %v288_v19 = vpop.f32.mrf.mxu0  ;;  %v1382_v20 = vmul.f32 %v933_v18, %v1318_v27  ;;  %v534_v27 = vld [vmem:[#allocation6 + $0x158] sm:$0xff] }
 0x10c   : > { %934 = vtanh.f32 %v288_v19  ;;  %543 = vmatpush.msra.mxu2 %v534_v27  ;;  %837 = vmatpush.msra.mxu3 %v534_v27 }
 0x10d   : > { %430 = vmatmul.f32.gmra.mxu1 %v1382_v20 }
 0x10e   : > { %544 = vmatpush.msra.mxu2 %v533_v29  ;;  %838 = vmatpush.msra.mxu3 %v533_v29 }
 0x110   : > { %545 = vmatpush.msra.mxu2 %v532_v30  ;;  %839 = vmatpush.msra.mxu3 %v532_v30 }
 0x112   : > { %v935_v25 = vpop.eup %934  ;;  %546 = vmatpush.msra.mxu2 %v531_v31  ;;  %840 = vmatpush.msra.mxu3 %v531_v31 }
 0x113   : > { %v291_v26 = vpop.f32.mrf.mxu0  ;;  %v1386_v28 = vmul.f32 %v935_v25, %v1322_v32 }
 0x114   : > { %936 = vtanh.f32 %v291_v26  ;;  %547 = vmatpush.msra.mxu2 %v530_v35  ;;  %841 = vmatpush.msra.mxu3 %v530_v35 }
 0x115   : > { %433 = vmatmul.f32.gmra.mxu1 %v1386_v28 }
 0x116   : > { %548 = vmatpush.msra.mxu2 %v529_v36  ;;  %842 = vmatpush.msra.mxu3 %v529_v36 }
 0x118   : > { %549 = vmatpush.msra.mxu2 %v528_v38  ;;  %843 = vmatpush.msra.mxu3 %v528_v38 }
 0x11a   : > { %v937_v33 = vpop.eup %936  ;;  %550 = vmatpush.msra.mxu2 %v527_v45  ;;  %844 = vmatpush.msra.mxu3 %v527_v45 }
 0x11b   : > { %v294_v34 = vpop.f32.mrf.mxu0  ;;  %v1390_v32 = vmul.f32 %v937_v33, %v1326_v37 }
 0x11c   : > { %938 = vtanh.f32 %v294_v34  ;;  %551 = vmatpush.msra.mxu2 %v526_v46  ;;  %845 = vmatpush.msra.mxu3 %v526_v46 }
 0x11d   : > { %436 = vmatmul.f32.gmra.mxu1 %v1390_v32 }
 0x11e   : > { %552 = vmatpush.msra.mxu2 %v525_v47  ;;  %846 = vmatpush.msra.mxu3 %v525_v47 }
 0x120   : > { %553 = vmatpush.msra.mxu2 %v524_v48  ;;  %847 = vmatpush.msra.mxu3 %v524_v48 }
 0x122   : > { %v939_v39 = vpop.eup %938 }
 0x123   : > { %v297_v40 = vpop.f32.mrf.mxu0  ;;  %v1394_v43 = vmul.f32 %v939_v39, %v1330_v41  ;;  %v523_v41 = vld [vmem:[#allocation6 + $0x100] sm:$0xff] }
 0x124   : > { %940 = vtanh.f32 %v297_v40  ;;  %554 = vmatpush.msra.mxu2 %v523_v41  ;;  %848 = vmatpush.msra.mxu3 %v523_v41 }
 0x125   : > { %439 = vmatmul.f32.gmra.mxu1 %v1394_v43 }
 0x12a   : > { %v941_v37 = vpop.eup %940 }
 0x12b   : > { %v1398_v44 = vmul.f32 %v941_v37, %v1334_v42 }
 0x12d   : > { %442 = vmatmul.f32.gmra.mxu1 %v1398_v44 }
 0x152   : > { %v410_v49 = vpop.f32.mrf.mxu1 }
 0x153   : > { %942 = vtanh.f32 %v410_v49 }
 0x159   : > { %v943_v42 = vpop.eup %942 }
 0x15a   : > { %v413_v50 = vpop.f32.mrf.mxu1  ;;  %v1402_v51 = vmul.f32 %v943_v42, %v1338_v52 }
 0x15b   : > { %944 = vtanh.f32 %v413_v50 }
 0x15c   : > { %555 = vmatmul.f32.vlgmr.msra.gmra.mxu2 %v1402_v51 }
 0x15e   : > { %v446_v53 = vpop.f32.mrf.mxu3 }
 0x15f   : > { %946 = vtanh.f32 %v446_v53 }
 0x161   : > { %v945_v54 = vpop.eup %944 }
 0x162   : > { %v416_v56 = vpop.f32.mrf.mxu1  ;;  %v1406_v57 = vmul.f32 %v945_v54, %v1346_v58 }
 0x163   : > { %948 = vtanh.f32 %v416_v56 }
 0x164   : > { %558 = vmatmul.f32.gmra.mxu2 %v1406_v57 }
 0x165   : > { %v947_v59 = vpop.eup %946 }
 0x166   : > { %v449_v60 = vpop.f32.mrf.mxu3  ;;  %v1410_v62 = vmul.f32 %v947_v59, %v1342_v55 }
 0x167   : > { %950 = vtanh.f32 %v449_v60 }
 0x168   : > { %591 = vmatmul.f32.vlgmr.msra.gmra.mxu3 %v1410_v62 }
 0x169   : > { %v949_v52 = vpop.eup %948 }
 0x16a   : > { %v419_v63 = vpop.f32.mrf.mxu1  ;;  %v1414_v1 = vmul.f32 %v949_v52, %v1354_v0 }
 0x16b   : > { %952 = vtanh.f32 %v419_v63 }
 0x16c   : > { %561 = vmatmul.f32.gmra.mxu2 %v1414_v1 }
 0x16d   : > { %v951_v58 = vpop.eup %950 }
 0x16e   : > { %v452_v2 = vpop.f32.mrf.mxu3  ;;  %v1418_v4 = vmul.f32 %v951_v58, %v1350_v61 }
 0x16f   : > { %954 = vtanh.f32 %v452_v2 }
 0x170   : > { %594 = vmatmul.f32.gmra.mxu3 %v1418_v4 }
 0x171   : > { %v953_v55 = vpop.eup %952 }
 0x172   : > { %v422_v5 = vpop.f32.mrf.mxu1  ;;  %v1422_v7 = vmul.f32 %v953_v55, %v1362_v6 }
 0x173   : > { %956 = vtanh.f32 %v422_v5 }
 0x174   : > { %564 = vmatmul.f32.gmra.mxu2 %v1422_v7 }
 0x175   : > { %v955_v0 = vpop.eup %954 }
 0x176   : > { %v455_v9 = vpop.f32.mrf.mxu3  ;;  %v1426_v10 = vmul.f32 %v955_v0, %v1358_v3 }
 0x177   : > { %958 = vtanh.f32 %v455_v9 }
 0x178   : > { %597 = vmatmul.f32.gmra.mxu3 %v1426_v10 }
 0x179   : > { %v957_v61 = vpop.eup %956 }
 0x17a   : > { %v425_v12 = vpop.f32.mrf.mxu1  ;;  %v1430_v13 = vmul.f32 %v957_v61, %v1370_v11 }
 0x17b   : > { %960 = vtanh.f32 %v425_v12 }
 0x17c   : > { %567 = vmatmul.f32.gmra.mxu2 %v1430_v13 }
 0x17d   : > { %v959_v6 = vpop.eup %958 }
 0x17e   : > { %v1434_v15 = vmul.f32 %v959_v6, %v1366_v8 }
 0x180   : > { %600 = vmatmul.f32.gmra.mxu3 %v1434_v15 }
 0x181   : > { %v961_v16 = vpop.eup %960 }
 0x182   : > { %v428_v3 = vpop.f32.mrf.mxu1  ;;  %v1438_v18 = vmul.f32 %v961_v16, %v1374_v14 }
 0x183   : > { %962 = vtanh.f32 %v428_v3 }
 0x184   : > { %570 = vmatmul.f32.gmra.mxu2 %v1438_v18 }
 0x189   : > { %v963_v19 = vpop.eup %962 }
 0x18a   : > { %v431_v11 = vpop.f32.mrf.mxu1  ;;  %v1442_v21 = vmul.f32 %v963_v19, %v1378_v17 }
 0x18b   : > { %964 = vtanh.f32 %v431_v11 }
 0x18c   : > { %573 = vmatmul.f32.gmra.mxu2 %v1442_v21 }
 0x191   : > { %v965_v8 = vpop.eup %964 }
 0x192   : > { %v434_v22 = vpop.f32.mrf.mxu1  ;;  %v1446_v23 = vmul.f32 %v965_v8, %v1382_v20 }
 0x193   : > { %966 = vtanh.f32 %v434_v22 }
 0x194   : > { %576 = vmatmul.f32.gmra.mxu2 %v1446_v23 }
 0x199   : > { %v967_v14 = vpop.eup %966 }
 0x19a   : > { %v437_v24 = vpop.f32.mrf.mxu1  ;;  %v1450_v25 = vmul.f32 %v967_v14, %v1386_v28 }
 0x19b   : > { %968 = vtanh.f32 %v437_v24 }
 0x19c   : > { %579 = vmatmul.f32.gmra.mxu2 %v1450_v25 }
 0x1a1   : > { %v969_v17 = vpop.eup %968 }
 0x1a2   : > { %v440_v26 = vpop.f32.mrf.mxu1  ;;  %v1454_v27 = vmul.f32 %v969_v17, %v1390_v32 }
 0x1a3   : > { %970 = vtanh.f32 %v440_v26 }
 0x1a4   : > { %582 = vmatmul.f32.gmra.mxu2 %v1454_v27 }
 0x1a9   : > { %v971_v20 = vpop.eup %970 }
 0x1aa   : > { %v443_v29 = vpop.f32.mrf.mxu1  ;;  %v1458_v30 = vmul.f32 %v971_v20, %v1394_v43 }
 0x1ab   : > { %972 = vtanh.f32 %v443_v29 }
 0x1ac   : > { %585 = vmatmul.f32.gmra.mxu2 %v1458_v30 }
 0x1b1   : > { %v973_v28 = vpop.eup %972 }
 0x1b2   : > { %v1462_v31 = vmul.f32 %v973_v28, %v1398_v44 }
 0x1b4   : > { %588 = vmatmul.f32.gmra.mxu2 %v1462_v31 }
 0x1df   : > { %v556_v33 = vpop.f32.mrf.mxu2 }
 0x1e0   : > { %974 = vtanh.f32 %v556_v33 }
 0x1e6   : > { %v975_v34 = vpop.eup %974 }
 0x1e7   : > { %v620_v32 = vmul.f32 %v975_v34, %v1402_v51  ;;  %v559_v35 = vpop.f32.mrf.mxu2 }
 0x1e8   : > { %976 = vtanh.f32 %v559_v35 }
 0x1e9   : > { %668 = vst [vmem:[%s1468_s15] sm:$0xff] %v620_v32 }
 0x1eb   : > { %v592_v36 = vpop.f32.mrf.mxu3 }
 0x1ec   : > { %978 = vtanh.f32 %v592_v36 }
 0x1ee   : > { %v977_v38 = vpop.eup %976 }
 0x1ef   : > { %v621_v39 = vmul.f32 %v977_v38, %v1406_v57  ;;  %v562_v40 = vpop.f32.mrf.mxu2 }
 0x1f0   : > { %980 = vtanh.f32 %v562_v40 }
 0x1f1   : > { %669 = vst [vmem:[%s1468_s15 + $0x8] sm:$0xff] %v621_v39 }
 0x1f2   : > { %v979_v43 = vpop.eup %978 }
 0x1f3   : > { %v632_v37 = vmul.f32 %v979_v43, %v1410_v62  ;;  %v595_v44 = vpop.f32.mrf.mxu3 }
 0x1f4   : > { %982 = vtanh.f32 %v595_v44 }
 0x1f5   : > { %680 = vst [vmem:[%s1468_s15 + $0x60] sm:$0xff] %v632_v37 }
 0x1f6   : > { %v981_v45 = vpop.eup %980 }
 0x1f7   : > { %v622_v46 = vmul.f32 %v981_v45, %v1414_v1  ;;  %v565_v47 = vpop.f32.mrf.mxu2 }
 0x1f8   : > { %984 = vtanh.f32 %v565_v47 }
 0x1f9   : > { %670 = vst [vmem:[%s1468_s15 + $0x10] sm:$0xff] %v622_v46 }
 0x1fa   : > { %v983_v48 = vpop.eup %982 }
 0x1fb   : > { %v633_v41 = vmul.f32 %v983_v48, %v1418_v4  ;;  %v598_v49 = vpop.f32.mrf.mxu3 }
 0x1fc   : > { %986 = vtanh.f32 %v598_v49 }
 0x1fd   : > { %681 = vst [vmem:[%s1468_s15 + $0x68] sm:$0xff] %v633_v41 }
 0x1fe   : > { %v985_v42 = vpop.eup %984 }
 0x1ff   : > { %v623_v50 = vmul.f32 %v985_v42, %v1422_v7  ;;  %v568_v51 = vpop.f32.mrf.mxu2 }
 0x200   : > { %988 = vtanh.f32 %v568_v51 }
 0x201   : > { %671 = vst [vmem:[%s1468_s15 + $0x18] sm:$0xff] %v623_v50 }
 0x202   : > { %v987_v53 = vpop.eup %986 }
 0x203   : > { %v634_v54 = vmul.f32 %v987_v53, %v1426_v10  ;;  %v601_v56 = vpop.f32.mrf.mxu3 }
 0x204   : > { %990 = vtanh.f32 %v601_v56 }
 0x205   : > { %682 = vst [vmem:[%s1468_s15 + $0x70] sm:$0xff] %v634_v54 }
 0x206   : > { %v989_v57 = vpop.eup %988 }
 0x207   : > { %v624_v59 = vmul.f32 %v989_v57, %v1430_v13  ;;  %v571_v60 = vpop.f32.mrf.mxu2 }
 0x208   : > { %992 = vtanh.f32 %v571_v60 }
 0x209   : > { %672 = vst [vmem:[%s1468_s15 + $0x20] sm:$0xff] %v624_v59 }
 0x20a   : > { %v991_v62 = vpop.eup %990 }
 0x20b   : > { %v635_v52 = vmul.f32 %v991_v62, %v1434_v15 }
 0x20d   : > { %683 = vst [vmem:[%s1468_s15 + $0x78] sm:$0xff] %v635_v52 }
 0x20e   : > { %v993_v63 = vpop.eup %992 }
 0x20f   : > { %v625_v1 = vmul.f32 %v993_v63, %v1438_v18  ;;  %v574_v58 = vpop.f32.mrf.mxu2 }
 0x210   : > { %994 = vtanh.f32 %v574_v58 }
 0x211   : > { %673 = vst [vmem:[%s1468_s15 + $0x28] sm:$0xff] %v625_v1 }
 0x216   : > { %v995_v2 = vpop.eup %994 }
 0x217   : > { %v626_v4 = vmul.f32 %v995_v2, %v1442_v21  ;;  %v577_v55 = vpop.f32.mrf.mxu2 }
 0x218   : > { %996 = vtanh.f32 %v577_v55 }
 0x219   : > { %674 = vst [vmem:[%s1468_s15 + $0x30] sm:$0xff] %v626_v4 }
 0x21e   : > { %v997_v5 = vpop.eup %996 }
 0x21f   : > { %v627_v7 = vmul.f32 %v997_v5, %v1446_v23  ;;  %v580_v0 = vpop.f32.mrf.mxu2 }
 0x220   : > { %998 = vtanh.f32 %v580_v0 }
 0x221   : > { %675 = vst [vmem:[%s1468_s15 + $0x38] sm:$0xff] %v627_v7 }
 0x226   : > { %v999_v9 = vpop.eup %998 }
 0x227   : > { %v628_v10 = vmul.f32 %v999_v9, %v1450_v25  ;;  %v583_v61 = vpop.f32.mrf.mxu2 }
 0x228   : > { %1000 = vtanh.f32 %v583_v61 }
 0x229   : > { %676 = vst [vmem:[%s1468_s15 + $0x40] sm:$0xff] %v628_v10 }
 0x22e   : > { %v1001_v12 = vpop.eup %1000 }
 0x22f   : > { %v629_v13 = vmul.f32 %v1001_v12, %v1454_v27  ;;  %v586_v6 = vpop.f32.mrf.mxu2 }
 0x230   : > { %1002 = vtanh.f32 %v586_v6 }
 0x231   : > { %677 = vst [vmem:[%s1468_s15 + $0x48] sm:$0xff] %v629_v13 }
 0x236   : > { %v1003_v15 = vpop.eup %1002 }
 0x237   : > { %v630_v16 = vmul.f32 %v1003_v15, %v1458_v30  ;;  %v589_v3 = vpop.f32.mrf.mxu2 }
 0x238   : > { %1004 = vtanh.f32 %v589_v3 }
 0x239   : > { %678 = vst [vmem:[%s1468_s15 + $0x50] sm:$0xff] %v630_v16 }
 0x23e   : > { %v1005_v18 = vpop.eup %1004 }
 0x23f   : > { %v631_v19 = vmul.f32 %v1005_v18, %v1462_v31 }
 0x241   : > { %679 = vst [vmem:[%s1468_s15 + $0x58] sm:$0xff] %v631_v19 }
 0x242   : > { %1093 = shalt.err (!%p1090_p10)
}
 0x243   : > { %s1141_s5 = smov 128   ;;  %s1142_s30 = smov 8  }
 0x244   : > { %855 = dma.vmem_to_hbm [thread:$0]  (%p1227_p3), %s698_s17, 2048, %s700_s18, %s685_s13, %s1141_s5, %s1141_s5, %s1142_s30  }
 0x245 PF: > { %s714_s6 = sand.u32 1, %s1124_s9   ;;  %p1543_p12 = scmp.ge.s32.totalorder %s1136_s12, 2 }
 0x246   : > { %s715_s7 = scalar_lea.sflag [#allocation5], %s714_s6 }
 0x247   : > { %p866_p13 = pnand %p1543_p12, %p1193_p6 }
 0x249   : > { %p867_p0 = pneg %p866_p13 }
 0x24b   : > { %1119 = dma.done.wait (%p867_p0), %s715_s7, 2048  }
 0x24c   : > { %1121 = vsyncadd (%p867_p0), %s715_s7, 4294965248  ;;  %p16_p5 = scmp.ge.s32.totalorder %s1211_s23, 4   ;;  %s1544_s9 = smov %s1128_s10 }
 0x24d   : > { %s1545_s10 = smov %s1132_s11  ;;  %s1546_s11 = smov %s1223_s28 }
 0x24e   : > { %s1547_s12 = smov %s1211_s23  ;;  %18 = sbr.rel (!%p16_p5) target bundleno = 6 (0x6), region = 79 }
 0x253   :  { %721 = vsyncpa [#allocation4], 1 }
 0x254   :  { %723 = vsyncpa [#allocation4 + $0x1], 1 }
 0x255   :  { %724 = vsyncpa [#allocation7], 1 }
 0x256   :  { %725 = vsyncpa [#allocation5], 1 }
 0x257   :  { %727 = vsyncpa [#allocation5 + $0x1], 1 }

</bundles_post_ra>
